<compile_context>
chip_gen: v5e
topology: v5e:2x2
jax: 0.10.0
libtpu: 0.0.40
codegen_flags: <defaults>
</compile_context>

<pallas_src>
import functools

import jax
import jax.numpy as jnp
from jax.experimental import pallas as pl
from jax.experimental.pallas import tpu as pltpu

_LANE = 128
_SUBLANE = 8
_MAX_TILE_B = 2048                      # cap on rows per grid step
_VMEM_BUDGET_BYTES = 12 * 1024 * 1024   # headroom under v5e's 16 MiB scoped default


def _round_up(x, m):
    return ((x + m - 1) // m) * m


def _choose_tile_b(B, in_size, out_size, hidden_p, out_p, weight_bytes, itemsize):
    """Largest batch tile that (a) fits the VMEM budget with double-buffered
    x/out + single-buffered weights + f32 intermediates, (b) stays <= cap, and
    (c) leaves >= 2 grid steps whenever B >= 16 (v7x has 2 TensorCores)."""
    budget = max(_VMEM_BUDGET_BYTES - weight_bytes, 1)
    per_row = 2 * itemsize * (in_size + out_size) + 4 * (hidden_p + out_p)
    vmem_cap = max(_SUBLANE, (budget // per_row) // _SUBLANE * _SUBLANE)
    two_step = _round_up(pl.cdiv(B, 2), _SUBLANE)
    return max(_SUBLANE, min(_MAX_TILE_B, vmem_cap, two_step))


def _encoder_feature_linear_kernel(x_ref, w1_ref, b1_ref, w2_ref, b2_ref, o_ref):
    # x_ref : (TILE_B, in_size)       w1_ref: (in_size, hidden_p)  b1_ref: (1, hidden_p)
    # w2_ref: (hidden_p, out_p)       b2_ref: (1, out_p)           o_ref : (TILE_B, out_size)
    x = x_ref[...]

    # Layer 1: bias-initialized f32 accumulator + MXU matmul, then ReLU.
    h = b1_ref[...] + jnp.dot(x, w1_ref[...], preferred_element_type=jnp.float32)
    h = jnp.maximum(h, 0.0)

    # Layer 2.
    y = b2_ref[...] + jnp.dot(h, w2_ref[...], preferred_element_type=jnp.float32)
    y = jnp.maximum(y, 0.0)

    # Store only the real output lanes (output array is unpadded).
    o_ref[...] = y[:, : o_ref.shape[-1]].astype(o_ref.dtype)


def prepare_params(w1, b1, w2, b2):
    """One-time setup: transpose to row-major matmul layout and zero-pad the
    hidden / second-layer-output dims to multiples of 128 lanes.

    w1: (hidden, in_size)  b1: (hidden,)  w2: (out_size, hidden)  b2: (out_size,)
    """
    hidden, in_size = w1.shape
    out_size = w2.shape[0]
    hidden_p = _round_up(hidden, _LANE)
    out_p = _round_up(out_size, _LANE)

    w1_t = jnp.zeros((in_size, hidden_p), w1.dtype).at[:, :hidden].set(w1.T)
    b1_r = jnp.zeros((1, hidden_p), b1.dtype).at[0, :hidden].set(b1)
    w2_t = jnp.zeros((hidden_p, out_p), w2.dtype).at[:hidden, :out_size].set(w2.T)
    b2_r = jnp.zeros((1, out_p), b2.dtype).at[0, :out_size].set(b2)
    return w1_t, b1_r, w2_t, b2_r, out_size


@functools.partial(jax.jit, static_argnames=("out_size",))
def _encoder_feature_linear_impl(x, w1_t, b1_r, w2_t, b2_r, *, out_size):
    B, in_size = x.shape
    hidden_p = w1_t.shape[1]
    out_p = w2_t.shape[1]
    itemsize = jnp.dtype(x.dtype).itemsize

    weight_bytes = itemsize * (w1_t.size + b1_r.size + w2_t.size + b2_r.size)
    tile_b = _choose_tile_b(B, in_size, out_size, hidden_p, out_p, weight_bytes, itemsize)
    grid = (pl.cdiv(B, tile_b),)   # ragged last block handled by Pallas (no x pad pass)

    cost = pl.CostEstimate(
        flops=2 * B * (in_size * hidden_p + hidden_p * out_p),
        transcendentals=0,
        bytes_accessed=itemsize
        * (B * in_size + w1_t.size + b1_r.size + w2_t.size + b2_r.size + B * out_size),
    )

    out = pl.pallas_call(
        _encoder_feature_linear_kernel,
        out_shape=jax.ShapeDtypeStruct((B, out_size), x.dtype),
        grid=grid,
        in_specs=[
            # x: tiled over batch, double-buffered by default.
            pl.BlockSpec((tile_b, in_size), lambda i: (i, 0)),
            # Weights / biases: constant index_map -> DMA'd once, single-buffered.
            pl.BlockSpec((in_size, hidden_p), lambda i: (0, 0),
                         pipeline_mode=pl.Buffered(1)),
            pl.BlockSpec((1, hidden_p), lambda i: (0, 0),
                         pipeline_mode=pl.Buffered(1)),
            pl.BlockSpec((hidden_p, out_p), lambda i: (0, 0),
                         pipeline_mode=pl.Buffered(1)),
            pl.BlockSpec((1, out_p), lambda i: (0, 0),
                         pipeline_mode=pl.Buffered(1)),
        ],
        out_specs=pl.BlockSpec((tile_b, out_size), lambda i: (i, 0)),
        compiler_params=pltpu.CompilerParams(
            dimension_semantics=("parallel",),
        ),
        cost_estimate=cost,
    )(x, w1_t, b1_r, w2_t, b2_r)

    # torch.unsqueeze(dim=1); free layout-wise (row-major bitcast).
    return out[:, None, :]


def encoder_feature_linear(x, params):
    """x: (B, in_size); params from prepare_params().  Returns (B, 1, out_size)."""
    w1_t, b1_r, w2_t, b2_r, out_size = params
    return _encoder_feature_linear_impl(x, w1_t, b1_r, w2_t, b2_r, out_size=out_size)


def _init_params(key, in_size, out_size, dtype=jnp.float32):
    """Deterministic init mirroring nn.Linear shapes (uniform like PyTorch default)."""
    hidden = out_size * 4
    k1, k2, k3, k4 = jax.random.split(key, 4)
    bound1 = 1.0 / (in_size ** 0.5)
    bound2 = 1.0 / (hidden ** 0.5)
    w1 = jax.random.uniform(k1, (hidden, in_size), dtype, -bound1, bound1)
    b1 = jax.random.uniform(k2, (hidden,), dtype, -bound1, bound1)
    w2 = jax.random.uniform(k3, (out_size, hidden), dtype, -bound2, bound2)
    b2 = jax.random.uniform(k4, (out_size,), dtype, -bound2, bound2)
    return w1, b1, w2, b2


def _reference(x, w1, b1, w2, b2):
    h = jnp.maximum(x @ w1.T + b1, 0.0)
    y = jnp.maximum(h @ w2.T + b2, 0.0)
    return y[:, None, :]


if __name__ == "__main__":
    in_size, out_size = 32, 16
    batch = 20   # not a multiple of the tile -> exercises the ragged boundary block

    key = jax.random.PRNGKey(0)
    kx, kp = jax.random.split(key)
    x = jax.random.normal(kx, (batch, in_size), jnp.float32)
    w1, b1, w2, b2 = _init_params(kp, in_size, out_size)

    # One-time parameter preparation (transpose + lane padding) — out of the hot path.
    params = prepare_params(w1, b1, w2, b2)

    out = encoder_feature_linear(x, params)
    out = jax.block_until_ready(out)

    ref = _reference(x, w1, b1, w2, b2)
    assert out.shape == (batch, 1, out_size), out.shape
    assert jnp.allclose(out, ref, atol=1e-5, rtol=1e-5), "mismatch vs reference"

    print("KERNEL_OK")
</pallas_src>

<mosaic_0001>
module attributes {stable_mosaic.version = 11 : i64} {
  func.func @_encoder_feature_linear_kernel(%arg0: i32, %arg1: memref<16x32xf32, #tpu.memory_space<vmem>>, %arg2: memref<32x128xf32, #tpu.memory_space<vmem>>, %arg3: memref<1x128xf32, #tpu.memory_space<vmem>>, %arg4: memref<128x128xf32, #tpu.memory_space<vmem>>, %arg5: memref<1x128xf32, #tpu.memory_space<vmem>>, %arg6: memref<16x16xf32, #tpu.memory_space<vmem>>) attributes {dimension_semantics = [#tpu.dimension_semantics<parallel>], iteration_bounds = array<i64: 2>, scalar_prefetch = 0 : i64, scratch_operands = 0 : i64, tpu.core_type = #tpu.core_type<tc>, window_params = [{transform_indices = @transform_0, window_bounds = array<i64: 16, 32>}, {pipeline_mode = #tpu.pipeline_mode<synchronous>, transform_indices = @transform_1, window_bounds = array<i64: 32, 128>}, {pipeline_mode = #tpu.pipeline_mode<synchronous>, transform_indices = @transform_2, window_bounds = array<i64: 1, 128>}, {pipeline_mode = #tpu.pipeline_mode<synchronous>, transform_indices = @transform_3, window_bounds = array<i64: 128, 128>}, {pipeline_mode = #tpu.pipeline_mode<synchronous>, transform_indices = @transform_4, window_bounds = array<i64: 1, 128>}, {transform_indices = @transform_5, window_bounds = array<i64: 16, 16>}]} {
    %c0 = arith.constant 0 : index
    %c0_0 = arith.constant 0 : index
    %0 = vector.load %arg1[%c0, %c0_0] : memref<16x32xf32, #tpu.memory_space<vmem>>, vector<16x32xf32>
    %c0_1 = arith.constant 0 : index
    %c0_2 = arith.constant 0 : index
    %1 = vector.load %arg3[%c0_1, %c0_2] : memref<1x128xf32, #tpu.memory_space<vmem>>, vector<1x128xf32>
    %c0_3 = arith.constant 0 : index
    %c0_4 = arith.constant 0 : index
    %2 = vector.load %arg2[%c0_3, %c0_4] : memref<32x128xf32, #tpu.memory_space<vmem>>, vector<32x128xf32>
    %cst = arith.constant dense<0.000000e+00> : vector<16x128xf32>
    %3 = tpu.matmul %0, %2, %cst {dimension_numbers = #tpu.dot_dimension_numbers<[1], [0], [0], [1], [0, 0, 1, 1], [], []>} : vector<16x32xf32>, vector<32x128xf32>, vector<16x128xf32> -> vector<16x128xf32>
    %4 = vector.broadcast %1 : vector<1x128xf32> to vector<16x128xf32>
    %5 = arith.addf %4, %3 : vector<16x128xf32>
    %cst_5 = arith.constant 0.000000e+00 : f32
    %6 = vector.broadcast %cst_5 : f32 to vector<16x128xf32>
    %7 = arith.maximumf %5, %6 : vector<16x128xf32>
    %c0_6 = arith.constant 0 : index
    %c0_7 = arith.constant 0 : index
    %8 = vector.load %arg5[%c0_6, %c0_7] : memref<1x128xf32, #tpu.memory_space<vmem>>, vector<1x128xf32>
    %c0_8 = arith.constant 0 : index
    %c0_9 = arith.constant 0 : index
    %9 = vector.load %arg4[%c0_8, %c0_9] : memref<128x128xf32, #tpu.memory_space<vmem>>, vector<128x128xf32>
    %cst_10 = arith.constant dense<0.000000e+00> : vector<16x128xf32>
    %10 = tpu.matmul %7, %9, %cst_10 {dimension_numbers = #tpu.dot_dimension_numbers<[1], [0], [0], [1], [0, 0, 1, 1], [], []>} : vector<16x128xf32>, vector<128x128xf32>, vector<16x128xf32> -> vector<16x128xf32>
    %11 = vector.broadcast %8 : vector<1x128xf32> to vector<16x128xf32>
    %12 = arith.addf %11, %10 : vector<16x128xf32>
    %cst_11 = arith.constant 0.000000e+00 : f32
    %13 = vector.broadcast %cst_11 : f32 to vector<16x128xf32>
    %14 = arith.maximumf %12, %13 : vector<16x128xf32>
    %15 = vector.extract_strided_slice %14 {offsets = [0, 0], sizes = [16, 16], strides = [1, 1]} : vector<16x128xf32> to vector<16x16xf32>
    %c0_12 = arith.constant 0 : index
    %c0_13 = arith.constant 0 : index
    %16 = vector.load %arg6[%c0_12, %c0_13] : memref<16x16xf32, #tpu.memory_space<vmem>>, vector<16x16xf32>
    tpu.vector_store %arg6[%c0_12, %c0_13], %15 {strides = array<i32>} : memref<16x16xf32, #tpu.memory_space<vmem>>, vector<16x16xf32>,
    return
  }
  func.func @transform_0(%arg0: i32) -> (i32, i32) {
    %c0_i32 = arith.constant 0 : i32
    %c0_i32_0 = arith.constant 0 : i32
    return %arg0, %c0_i32 : i32, i32
  }
  func.func @transform_1(%arg0: i32) -> (i32, i32) {
    %c0_i32 = arith.constant 0 : i32
    %c0_i32_0 = arith.constant 0 : i32
    %c0_i32_1 = arith.constant 0 : i32
    return %c0_i32, %c0_i32_0 : i32, i32
  }
  func.func @transform_2(%arg0: i32) -> (i32, i32) {
    %c0_i32 = arith.constant 0 : i32
    %c0_i32_0 = arith.constant 0 : i32
    %c0_i32_1 = arith.constant 0 : i32
    return %c0_i32, %c0_i32_0 : i32, i32
  }
  func.func @transform_3(%arg0: i32) -> (i32, i32) {
    %c0_i32 = arith.constant 0 : i32
    %c0_i32_0 = arith.constant 0 : i32
    %c0_i32_1 = arith.constant 0 : i32
    return %c0_i32, %c0_i32_0 : i32, i32
  }
  func.func @transform_4(%arg0: i32) -> (i32, i32) {
    %c0_i32 = arith.constant 0 : i32
    %c0_i32_0 = arith.constant 0 : i32
    %c0_i32_1 = arith.constant 0 : i32
    return %c0_i32, %c0_i32_0 : i32, i32
  }
  func.func @transform_5(%arg0: i32) -> (i32, i32) {
    %c0_i32 = arith.constant 0 : i32
    %c0_i32_0 = arith.constant 0 : i32
    return %arg0, %c0_i32 : i32, i32
  }
}

</mosaic_0001>

<bundles_post_ra>
// kernel: _encoder_feature_linear_impl.1
= control target key start
LH: loop header
LB: loop body
LE: loop exit
PB: predicated region body
PF: predicated region fallthrough
CT: control target
= control target key end

     0   :  { %10 = vsyncpa [#allocation3], 0  ;;  %s1244_s0 = inlined_call_operand.hbm [shape: f32[20,32], index: 0, kind: input, shape index: {}]   ;;  %s1245_s1 = inlined_call_operand.hbm [shape: f32[32,128], index: 1, kind: input, shape index: {}]   ;;  %s1246_s2 = inlined_call_operand.vmem [shape: f32[1,128], index: 2, kind: input, shape index: {}]   ;;  %s1247_s3 = inlined_call_operand.hbm [shape: f32[128,128], index: 3, kind: input, shape index: {}]   ;;  %s1248_s4 = inlined_call_operand.vmem [shape: f32[1,128], index: 4, kind: input, shape index: {}]   ;;  %s1249_s5 = inlined_call_operand.vmem [shape: f32[20,16], index: 5, kind: output, shape index: {}]  }
   0x1   :  { %12 = vsyncpa [#allocation3 + $0x1], 0 }
   0x2   :  { %13 = vsyncpa [#allocation5], 0  ;;  %s1055_s18 = smov 0   ;;  %s1057_s19 = smov 0  }
   0x3   :  { %s1059_s20 = smov 0   ;;  %s1061_s21 = smov 0  }
   0x4 LB: > { %s1074_s22 = sadd.s32 4294967295, %s984_s21   ;;  %s1077_s23 = sadd.s32 1, %s984_s21   ;;  %s984_s21 = sphi %s1061_s21, %s1261_s21   ;;  %s980_s20 = sphi %s1059_s20, %s1260_s20   ;;  %s976_s19 = sphi %s1057_s19, %s1259_s19   ;;  %s972_s18 = sphi %s1055_s18, %s1258_s18  }
   0x5   : > { %s23_s24 = ssub.s32 %s984_s21, %s1077_s23  ;;  %s26_s25 = sadd.s32 1, %s980_s20 }
   0x6   : > { %p24_p0 = scmp.eq.s32.totalorder %s23_s24, 0  ;;  %p33_p1 = scmp.ne.s32.totalorder %s980_s20, %s976_s19 }
   0x7   : > { %p34_p2 = scmp.eq.s32.totalorder %s984_s21, 0  ;;  %p39_p3 = scmp.ne.s32.totalorder %s976_s19, %s972_s18 }
   0x8   : > { %s1087_s26 = scalar_select %p24_p0, %s980_s20, %s26_s25  }
   0x9   : > { %p1089_p4 = por %p34_p2, %p33_p1  ;;  %p1250_p5 = scmp.eq.s32.totalorder %s1074_s22, 0 }
   0xa   : > { %p147_p6 = scmp.eq.s32.totalorder %s1074_s22, 1  ;;  %p636_p7 = scmp.ge.s32.totalorder %s984_s21, 1 }
   0xb   : > { %p1098_p8 = por %p1250_p5, %p39_p3  ;;  %p160_p9 = scmp.lt.s32.totalorder %s984_s21, 3 }
   0xc   : > { %p1103_p10 = por %p147_p6, %p33_p1  ;;  %s171_s8 = sshll.u32 %s1245_s1, 4  ;;  %s172_s8 = int_to_ptr.hbm [resolvable:$true] %s171_s8 }
   0xd   : > { %p1107_p11 = pnand %p636_p7, %p160_p9  ;;  %s1018_s9 = smov [#allocation4]  }
   0xe   : > { %s173_s10 = sshll.u32 %s1018_s9, 4  ;;  %s188_s13 = sshll.u32 %s1247_s3, 4  ;;  %s174_s10 = int_to_ptr.vmem [resolvable:$true] %s173_s10  ;;  %s189_s13 = int_to_ptr.hbm [resolvable:$true] %s188_s13 }
   0xf   : > { %p700_p12 = pneg %p1107_p11  ;;  %s1019_s14 = smov 128  }
  0x10   : > { %s1020_s15 = smov 8   ;;  %s1021_s16 = smov [#allocation6]  }
  0x11   : > { %p701_p13 = pnand %p700_p12, %p1250_p5  ;;  %s190_s17 = sshll.u32 %s1021_s16, 4  ;;  %s191_s17 = int_to_ptr.vmem [resolvable:$true] %s190_s17 }
  0x12   : > { %p639_p0 = scmp.ge.s32.totalorder %s984_s21, 2 }
  0x13   : > { %703 = dma.hbm_to_vmem [thread:$0]  (!%p701_p13), %s172_s8, 512, %s174_s10, [#allocation5], %s1019_s14, %s1019_s14, %s1020_s15  }
  0x14   : > { %706 = dma.hbm_to_vmem [thread:$0]  (!%p701_p13), %s189_s13, 2048, %s191_s17, [#allocation5], %s1019_s14, %s1019_s14, %s1020_s15  }
  0x15   : > { %203 = sbr.rel (%p639_p0) target bundleno = 62 (0x3e), region = 32 }
  0x1a   : > { %206 = sbr.rel (!%p1089_p4) target bundleno = 62 (0x3e), region = 36  ;;  %s207_s18 = sand.u32 (%p1089_p4), 1, %s980_s20  }
  0x1b   : > { %s641_s24 = sshll.u32 (%p1089_p4), %s984_s21, 1  ;;  %s640_s25 = sshll.u32 (%p1089_p4), %s207_s18, 4 }
  0x1c   : > { %s213_s6 = ssub.s32 (%p1089_p4), 3, %s641_s24  ;;  %s1129_s10 = scalar_lea.sflag (%p1089_p4), [#allocation3], %s207_s18 }
  0x1d   : > { %p214_p1 = scmp.lt.s32.totalorder (%p1089_p4), %s213_s6, 2  ;;  %s211_s11 = scalar_lea.vmem (%p1089_p4), [#allocation2], %s640_s25 }
  0x1f   : > { %s1263_s6 = smov (!%p214_p1, %s213_s6), 2 }
  0x20   : > { %s642_s7 = sshll.u32 %s1263_s6, 3 }
  0x21   : > { %s217_s8 = ssub.s32 16, %s642_s7 }
  0x22   : > { %s218_s9 = sshll.u32 %s217_s8, 4 }
  0x23   : > { %219 = vsyncadd %s1129_s10, %s218_s9  ;;  %p1132_p2 = scmp.ne.s32.totalorder %s642_s7, 0  ;;  %s671_s12 = sshll.u32 %s984_s21, 4 }
  0x24   : > { %s222_s15 = scalar_lea.hbm %s1244_s0, %s671_s12  ;;  %s1140_s16 = sshll.u32 %s211_s11, 4  ;;  %s227_s16 = int_to_ptr.vmem [resolvable:$true] %s1140_s16 }
  0x25   : > { %s224_s17 = sshll.u32 %s222_s15, 4  ;;  %s646_s18 = sshll.u32 %s1263_s6, 7  ;;  %s1143_s17 = int_to_ptr.hbm [resolvable:$true] %s224_s17 }
  0x26   : > { %s875_s24 = sshra.s32 %s1143_s17, 4  ;;  %s877_s25 = sshrl.u32 %s646_s18, 4  ;;  %s876_s24 = int_to_ptr.hbm [resolvable:$true] %s875_s24 }
  0x27   : > { %s882_s7 = scalar_lea.hbm %s876_s24, %s877_s25  ;;  %s886_s9 = scalar_lea.hbm %s1244_s0, 24 }
  0x28   : > { %p883_p3 = scmp.ne.s32.totalorder %s876_s24, %s882_s7  ;;  %p887_p7 = scmp.lt.s32.totalorder %s876_s24, %s1244_s0 }
  0x29   : > { %p888_p9 = scmp.lt.s32.totalorder %s886_s9, %s882_s7 }
  0x2a   : > { %p884_p4 = pnand %p883_p3, %p1132_p2 }
  0x2b   : > { %p889_p12 = por %p888_p9, %p887_p7 }
  0x2c   : > { %p885_p6 = pneg %p884_p4 }
  0x2e   : > { %p890_p13 = pnand %p889_p12, %p885_p6 }
  0x30   : > { %893 = shalt.err (!%p890_p13)
}
  0x31   : > { %s894_s13 = sshra.s32 %s227_s16, 4  ;;  %s1022_s15 = smov [#allocation2]   ;;  %s895_s13 = int_to_ptr.vmem [resolvable:$true] %s894_s13 }
  0x32   : > { %s901_s14 = scalar_lea.vmem %s895_s13, %s877_s25  ;;  %s905_s21 = scalar_lea.vmem %s1022_s15, 32 }
  0x33   : > { %p902_p0 = scmp.ne.s32.totalorder %s895_s13, %s901_s14  ;;  %p907_p4 = scmp.lt.s32.totalorder %s905_s21, %s901_s14 }
  0x35   : > { %p903_p1 = pnand %p902_p0, %p1132_p2 }
  0x37   : > { %p904_p3 = pneg %p903_p1 }
  0x39   : > { %p909_p5 = pnand %p907_p4, %p904_p3 }
  0x3b   : > { %912 = shalt.err (!%p909_p5)
}
  0x3c   : > { %s1023_s24 = smov 128   ;;  %s1024_s7 = smov 8  }
  0x3d   : > { %232 = dma.hbm_to_vmem [thread:$0]  (%p1132_p2), %s1143_s17, %s646_s18, %s227_s16, %s1129_s10, %s1023_s24, %s1023_s24, %s1024_s7  }
  0x3e PF: > { %238 = sbr.rel (%p1107_p11) target bundleno = 393 (0x189), region = 40  ;;  %s240_s25 = sand.u32 (!%p1107_p11), 1, %s976_s19  }
  0x3f   : > { %s1172_s8 = sshll.u32 (!%p1107_p11), %s240_s25, 4  ;;  %s241_s9 = scalar_lea.sflag (!%p1107_p11), [#allocation3], %s240_s25 }
  0x40   : > { %s244_s11 = scalar_lea.vmem (!%p1107_p11), [#allocation2], %s1172_s8 }
  0x43   : > { %963 = dma.done.wait (%p1098_p8), %s241_s9, 256  }
  0x44   : > { %965 = vsyncadd (%p1098_p8), %s241_s9, 4294967040  ;;  %p1256_p5 = scmp.eq.s32.totalorder %s1074_s22, 0 }
  0x46   : > { %967 = dma.done.wait (%p1256_p5), [#allocation5], 2560   ;;  %p1257_p2 = pmov %p1256_p5 }
  0x47   : > { %v297_v0 = vld [vmem:[#allocation4 + $0x18] sm:$0xff]  ;;  %v296_v1 = vld [vmem:[#allocation4 + $0x10] sm:$0xff]  ;;  %v295_v2 = vld [vmem:[#allocation4 + $0x8] sm:$0xff]  ;;  %vm298_vm0 = vcmask 261120   ;;  %vm382_vm1 = vcmask 130048   ;;  %s1196_s27 = scalar_lea.vmem [#allocation7], %s1172_s8  }
  0x48   : > { %969 = vsyncadd (%p1257_p2), [#allocation5], 4294964736  ;;  %317 = vmatpush.msra.mxu0 %v297_v0  ;;  %v351_v3 = vld [vmem:[#allocation6 + $0x78] sm:$0xff]  ;;  %v350_v4 = vld [vmem:[#allocation6 + $0x70] sm:$0xff]  ;;  %s655_s16 = sshll.u32 (%p1103_p10), %s1074_s22, 1  ;;  %s672_s17 = sshll.u32 (%p1103_p10), %s1074_s22, 4 }
  0x49   : > { %352 = vmatpush.msra.mxu1 %v351_v3  ;;  %v294_v5 = vld [vmem:[#allocation4] sm:$0xff]  ;;  %v349_v6 = vld [vmem:[#allocation6 + $0x68] sm:$0xff]  ;;  %675 = vmatpush.msra.mxu2 %v351_v3  ;;  %v347_v9 = vld [vmem:[#allocation6 + $0x58] sm:$0xff]  ;;  %s393_s18 = ssub.s32 (%p1103_p10), 3, %s655_s16  ;;  %s1207_s14 = scalar_lea.vmem (%p1103_p10), %s1249_s5, %s672_s17  }
  0x4a   : > { %318 = vmatpush.msra.mxu0 %v296_v1  ;;  %v291_v7 = vld [vmem:[%s244_s11] sm:$0xff]  ;;  %v345_v11 = vld [vmem:[#allocation6 + $0x48] sm:$0xff]  ;;  %v343_v14 = vld [vmem:[#allocation6 + $0x38] sm:$0xff]  ;;  %p394_p8 = scmp.lt.s32.totalorder (%p1103_p10), %s393_s18, 2 }
  0x4b   : > { %353 = vmatpush.msra.mxu1 %v350_v4  ;;  %v348_v8 = vld [vmem:[#allocation6 + $0x60] sm:$0xff]  ;;  %676 = vmatpush.msra.mxu2 %v350_v4  ;;  %v346_v10 = vld [vmem:[#allocation6 + $0x50] sm:$0xff]  ;;  %v292_v12 = vld [vmem:[%s244_s11 + $0x8] sm:$0xff] }
  0x4c   : > { %319 = vmatpush.msra.mxu0 %v295_v2  ;;  %v344_v13 = vld [vmem:[#allocation6 + $0x40] sm:$0xff]  ;;  %v342_v15 = vld [vmem:[#allocation6 + $0x30] sm:$0xff]  ;;  %v341_v16 = vld [vmem:[#allocation6 + $0x28] sm:$0xff] }
  0x4d   : > { %354 = vmatpush.msra.mxu1 %v349_v6  ;;  %677 = vmatpush.msra.mxu2 %v349_v6  ;;  %v340_v17 = vld [vmem:[#allocation6 + $0x20] sm:$0xff]  ;;  %v339_v18 = vld [vmem:[#allocation6 + $0x18] sm:$0xff]  ;;  %v338_v19 = vld [vmem:[#allocation6 + $0x10] sm:$0xff] }
  0x4e   : > { %320 = vmatpush.msra.mxu0 %v294_v5  ;;  %v337_v20 = vld [vmem:[#allocation6 + $0x8] sm:$0xff]  ;;  %v336_v21 = vld [vmem:[#allocation6] sm:$0xff] }
  0x4f   : > { %652 = vmatmul.msk.f32.vlgmr.msra.gmra.mxu0 %vm298_vm0, %v291_v7  ;;  %355 = vmatpush.msra.mxu1 %v348_v8  ;;  %v813_v22 = vld [vmem:[%s1246_s2] ss:$0 sm:$0xff] }
  0x50   : > { %678 = vmatpush.msra.mxu2 %v348_v8  ;;  %v814_v29 = vld [vmem:[%s1248_s4] ss:$0 sm:$0xff] }
  0x51   : > { %356 = vmatpush.msra.mxu1 %v347_v9 }
  0x52   : > { %679 = vmatpush.msra.mxu2 %v347_v9 }
  0x53   : > { %357 = vmatpush.msra.mxu1 %v346_v10 }
  0x54   : > { %680 = vmatpush.msra.mxu2 %v346_v10 }
  0x55   : > { %358 = vmatpush.msra.mxu1 %v345_v11 }
  0x56   : > { %681 = vmatpush.msra.mxu2 %v345_v11 }
  0x57   : > { %653 = vmatmul.msk.f32.gmra.mxu0 %vm298_vm0, %v292_v12  ;;  %359 = vmatpush.msra.mxu1 %v344_v13 }
  0x58   : > { %682 = vmatpush.msra.mxu2 %v344_v13 }
  0x59   : > { %360 = vmatpush.msra.mxu1 %v343_v14 }
  0x5a   : > { %683 = vmatpush.msra.mxu2 %v343_v14 }
  0x5b   : > { %361 = vmatpush.msra.mxu1 %v342_v15 }
  0x5c   : > { %684 = vmatpush.msra.mxu2 %v342_v15 }
  0x5d   : > { %362 = vmatpush.msra.mxu1 %v341_v16 }
  0x5e   : > { %685 = vmatpush.msra.mxu2 %v341_v16 }
  0x5f   : > { %363 = vmatpush.msra.mxu1 %v340_v17 }
  0x60   : > { %686 = vmatpush.msra.mxu2 %v340_v17 }
  0x61   : > { %364 = vmatpush.msra.mxu1 %v339_v18 }
  0x62   : > { %687 = vmatpush.msra.mxu2 %v339_v18 }
  0x63   : > { %365 = vmatpush.msra.mxu1 %v338_v19 }
  0x64   : > { %688 = vmatpush.msra.mxu2 %v338_v19 }
  0x65   : > { %366 = vmatpush.msra.mxu1 %v337_v20 }
  0x66   : > { %689 = vmatpush.msra.mxu2 %v337_v20 }
  0x67   : > { %367 = vmatpush.msra.mxu1 %v336_v21 }
  0x68   : > { %690 = vmatpush.msra.mxu2 %v336_v21 }
  0xcc   : > { %v322_v23 = vpop.f32.mrf.mxu0 }
  0xcd   : > { %v331_v24 = vadd.f32 %v813_v22, %v322_v23 }
  0xcf   : > { %v333_v25 = vmax.f32 %v331_v24, 0.0 }
  0xd1   : > { %368 = vmatmul.f32.vlgmr.msra.gmra.mxu1 %v333_v25 }
  0xd4   : > { %v325_v26 = vpop.f32.mrf.mxu0 }
  0xd5   : > { %v332_v27 = vadd.f32 %v813_v22, %v325_v26 }
  0xd7   : > { %v334_v28 = vmax.f32 %v332_v27, 0.0 }
  0xd9   : > { %371 = vmatmul.f32.vlgmr.msra.gmra.mxu2 %v334_v28 }
 0x14e   : > { %v369_v30 = vpop.f32.mrf.mxu1 }
 0x14f   : > { %v378_v31 = vadd.f32 %v814_v29, %v369_v30 }
 0x151   : > { %v380_v32 = vmax.f32 %v378_v31, 0.0 }
 0x153   : > { %383 = vst.msk [vmem:[%s1196_s27] sm:$0xff] %vm382_vm1, %v380_v32 }
 0x15c   : > { %v372_v33 = vpop.f32.mrf.mxu2 }
 0x15d   : > { %v379_v34 = vadd.f32 %v814_v29, %v372_v33  ;;  %391 = sbr.rel (!%p1103_p10) target bundleno = 393 (0x189), region = 56 }
 0x15f   : > { %v381_v35 = vmax.f32 %v379_v34, 0.0 }
 0x161   : > { %384 = vst.msk [vmem:[%s1196_s27 + $0x8] sm:$0xff] %vm382_vm1, %v381_v35 }
 0x162   : > { %s1265_s18 = smov (!%p394_p8, %s393_s18), 2 }
 0x163   : > { %s656_s15 = sshll.u32 %s1265_s18, 3 }
 0x164   : > { %p659_p11 = scmp.eq.s32.totalorder %s656_s15, 0 }
 0x165   : > { %s1213_s29 = sshrl.u32 (!%p659_p11), %s1265_s18, 1 }
 0x166   : > { %402 = sbr.rel (%p659_p11) target bundleno = 393 (0x189), region = 60  ;;  %p660_p10 = scmp.le.s32.totalorder (!%p659_p11), %s1213_s29, 0 }
 0x16b   : > { %570 = sbr.rel (%p660_p10) target bundleno = 376 (0x178), region = 142  ;;  %s986_s22 = smov (!%p660_p10), %s1207_s14  }
 0x16c   : > { %s990_s21 = smov (!%p660_p10), %s1196_s27   ;;  %s994_s24 = smov (!%p660_p10), 0  }
 0x16d   : > { %s998_s7 = smov (!%p660_p10), 0  }
 0x170 LB: >> { %v467_v36 = vld [vmem:[%s992_s21] sm:$0xff]  ;;  %v469_v37 = vld [vmem:[%s992_s21 + $0x8] sm:$0xff]  ;;  %s471_s25 = sadd.s32 1, %s996_s24  ;;  %s461_s7 = sadd.s32 1, %s1000_s7   ;;  %s1000_s7 = sphi %s998_s7, %s461_s7   ;;  %s996_s24 = sphi %s994_s24, %s995_s24   ;;  %s992_s21 = sphi %s990_s21, %s476_s21   ;;  %s988_s22 = sphi %s986_s22, %s477_s22  }
 0x171   : >> { %468 = vst [vmem:[%s988_s22] sm:$0xff] %v467_v36  ;;  %p472_p6 = scmp.ge.s32.totalorder %s471_s25, %s1213_s29  ;;  %p460_p7 = scmp.ge.s32.totalorder %s461_s7, %s1213_s29 }
 0x172   : >> { %470 = vst [vmem:[%s988_s22 + $0x8] sm:$0xff] %v469_v37 }
 0x173   : >> { %s1267_s25 = smov (%p472_p6, %s471_s25), 0  ;;  %463 = sbr.rel (!%p460_p7) target bundleno = 368 (0x170), region = 148 }
 0x174   : >> { %s661_s8 = sshll.u32 %s1267_s25, 4  ;;  %s995_s24 = smov %s1267_s25  }
 0x175   : >> { %s476_s21 = scalar_lea.vmem %s1196_s27, %s661_s8 [#allocation7]   ;;  %s477_s22 = scalar_lea.vmem %s1207_s14, %s661_s8  }
 0x178 PF: > { %s1223_s9 = sand.u32 1, %s1265_s18   ;;  %s673_s11 = sshll.u32 %s1213_s29, 4 }
 0x179   : > { %s482_s28 = scalar_lea.vmem %s1196_s27, %s673_s11 [#allocation7]   ;;  %s484_s30 = scalar_lea.vmem %s1207_s14, %s673_s11  }
 0x17a   : > { %p666_p9 = scmp.le.s32.totalorder %s1223_s9, 0 }
 0x17b   : > { %s1002_s6 = smov (!%p666_p9), %s484_s30   ;;  %s1006_s10 = smov (!%p666_p9), %s482_s28  }
 0x17c   : > { %584 = sbr.rel (%p666_p9) target bundleno = 393 (0x189), region = 153  ;;  %s1010_s16 = smov (!%p666_p9), 0  }
 0x17d   : > { %s1014_s17 = smov (!%p666_p9), 0  }
 0x181 LB: >> { %v494_v38 = vld [vmem:[%s1008_s10] sm:$0xff]  ;;  %s496_s18 = sadd.s32 1, %s1012_s16  ;;  %s488_s17 = sadd.s32 1, %s1016_s17   ;;  %s1016_s17 = sphi %s1014_s17, %s488_s17   ;;  %s1012_s16 = sphi %s1010_s16, %s1011_s16   ;;  %s1008_s10 = sphi %s1006_s10, %s501_s10   ;;  %s1004_s6 = sphi %s1002_s6, %s502_s6  }
 0x182   : >> { %495 = vst [vmem:[%s1004_s6] sm:$0xff] %v494_v38  ;;  %p497_p12 = scmp.ge.s32.totalorder %s496_s18, %s1223_s9  ;;  %p487_p13 = scmp.ge.s32.totalorder %s488_s17, %s1223_s9 }
 0x184   : >> { %s1269_s18 = smov (%p497_p12, %s496_s18), 0  ;;  %490 = sbr.rel (!%p487_p13) target bundleno = 385 (0x181), region = 159 }
 0x185   : >> { %s667_s27 = sshll.u32 %s1269_s18, 3  ;;  %s1011_s16 = smov %s1269_s18  }
 0x186   : >> { %s501_s10 = scalar_lea.vmem %s482_s28, %s667_s27 [#allocation7]   ;;  %s502_s6 = scalar_lea.vmem %s484_s30, %s667_s27  }
 0x189 PF: > { %p16_p0 = scmp.ge.s32.totalorder %s1077_s23, 4   ;;  %s1258_s18 = smov %s976_s19 }
 0x18a   : > { %s1259_s19 = smov %s980_s20  ;;  %s1260_s20 = smov %s1087_s26 }
 0x18b   : > { %s1261_s21 = smov %s1077_s23  ;;  %18 = sbr.rel (!%p16_p0) target bundleno = 4 (0x4), region = 170 }
 0x190   :  { %518 = vsyncpa [#allocation3], 1 }
 0x191   :  { %520 = vsyncpa [#allocation3 + $0x1], 1 }
 0x192   :  { %521 = vsyncpa [#allocation5], 1 }

</bundles_post_ra>
